<compile_context>
chip_gen: v7x
topology: tpu7x:2x2x1
jax: 0.10.0
libtpu: 0.0.40
codegen_flags: <defaults>
</compile_context>

<pallas_src>
import functools

import jax
import jax.numpy as jnp
from jax.experimental import pallas as pl
from jax.experimental.pallas import tpu as pltpu


def _round_up(x, m):
    return ((x + m - 1) // m) * m


def _dice_partials_kernel(logits_ref, labels_ref, inter_ref, card_ref,
                          inter_acc, card_acc, *, hw):
    """Accumulates per-class intersection / cardinality for one image (grid axis 0)."""
    j = pl.program_id(1)
    c, t = logits_ref.shape

    @pl.when(j == 0)
    def _():
        inter_acc[...] = jnp.zeros_like(inter_acc)
        card_acc[...] = jnp.zeros_like(card_acc)

    # Lane-dense block: classes on sublanes, pixels on lanes.
    x = logits_ref[...].astype(jnp.float32)                     # (C, T)
    m = jnp.max(x, axis=0, keepdims=True)                       # (1, T)
    e = jnp.exp(x - m)                                          # EUP
    denom = jnp.sum(e, axis=0, keepdims=True)                   # (1, T)
    probs = e * pl.reciprocal(denom, approx=True)               # EUP vrcp (free slot)

    labels = labels_ref[...]                                    # (1, T) int32
    class_ids = jax.lax.broadcasted_iota(jnp.int32, (c, t), 0)  # (C, T)
    match = class_ids == labels                                 # (C, T) bool (one-hot, unmaterialized)

    # Mask pixels past the end of the image (ragged last tile).
    lane = jax.lax.broadcasted_iota(jnp.int32, (1, t), 1)
    valid = (j * t + lane) < hw                                 # (1, T) bool

    inter_acc[...] += jnp.where(match & valid, probs, 0.0)
    card_acc[...] += jnp.where(valid, probs + match.astype(jnp.float32), 0.0)

    # Single deferred cross-lane reduce per image.
    @pl.when(j == pl.num_programs(1) - 1)
    def _():
        inter_ref[...] = jnp.sum(inter_acc[...], axis=1, keepdims=True)  # (C, 1)
        card_ref[...] = jnp.sum(card_acc[...], axis=1, keepdims=True)    # (C, 1)


def dice_loss(logits_nchw, true_nhw, smooth=1.0, tile_hw=8192):
    """Pallas TPU dice loss matching PyTorch DiceLoss.forward semantics."""
    n, c, h, w = logits_nchw.shape
    hw = h * w

    # Tile over pixels: multiple of 128 lanes, capped at the (lane-padded) image size.
    tile = max(128, min(_round_up(int(tile_hw), 128), _round_up(hw, 128)))
    grid = (n, pl.cdiv(hw, tile))

    # Pure reshapes -- no HBM transpose.
    logits_nc_hw = logits_nchw.reshape(n, c, hw)
    labels_n1_hw = true_nhw.reshape(n, 1, hw).astype(jnp.int32)

    kernel = functools.partial(_dice_partials_kernel, hw=hw)

    inter_nc1, card_nc1 = pl.pallas_call(
        kernel,
        out_shape=(jax.ShapeDtypeStruct((n, c, 1), jnp.float32),
                   jax.ShapeDtypeStruct((n, c, 1), jnp.float32)),
        grid_spec=pltpu.PrefetchScalarGridSpec(
            num_scalar_prefetch=0,
            grid=grid,
            in_specs=[
                pl.BlockSpec((None, c, tile), lambda i, j: (i, 0, j)),
                pl.BlockSpec((None, 1, tile), lambda i, j: (i, 0, j)),
            ],
            out_specs=[
                pl.BlockSpec((None, c, 1), lambda i, j: (i, 0, 0)),
                pl.BlockSpec((None, c, 1), lambda i, j: (i, 0, 0)),
            ],
            scratch_shapes=[
                pltpu.VMEM((c, tile), jnp.float32),
                pltpu.VMEM((c, tile), jnp.float32),
            ],
        ),
        compiler_params=pltpu.CompilerParams(
            # Image axis is independent across output rows -> megacore-parallel on v7x.
            dimension_semantics=("parallel", "arbitrary"),
            vmem_limit_bytes=32 * 1024 * 1024,
        ),
    )(logits_nc_hw, labels_n1_hw)

    # Tiny (N, C) finalize in the wrapper (per-review: cheap, keeps grid parallel).
    inter = jnp.sum(inter_nc1[:, :, 0], axis=0)  # (C,)
    card = jnp.sum(card_nc1[:, :, 0], axis=0)    # (C,)
    dice = (2.0 * inter + smooth) / (card + smooth)
    return 1.0 - jnp.mean(dice)


def dice_loss_ref(logits_nchw, true_nhw, smooth=1.0):
    """Pure-JAX reference mirroring the PyTorch module."""
    probs = jax.nn.softmax(logits_nchw, axis=1)                  # (N, C, H, W)
    c = probs.shape[1]
    one_hot = jax.nn.one_hot(true_nhw, c, dtype=jnp.float32)     # (N, H, W, C)
    one_hot = jnp.transpose(one_hot, (0, 3, 1, 2))               # (N, C, H, W)
    dims = (0, 2, 3)
    intersection = jnp.sum(probs * one_hot, axis=dims)
    cardinality = jnp.sum(probs + one_hot, axis=dims)
    dice = (2.0 * intersection + smooth) / (cardinality + smooth)
    return 1.0 - jnp.mean(dice)


if __name__ == "__main__":
    key = jax.random.PRNGKey(0)
    k1, k2 = jax.random.split(key)

    N, C, H, W = 2, 4, 16, 16
    logits = jax.random.normal(k1, (N, C, H, W), dtype=jnp.float32)
    true = jax.random.randint(k2, (N, H, W), 0, C, dtype=jnp.int32)

    loss = jax.block_until_ready(dice_loss(logits, true, smooth=1.0))
    ref = jax.block_until_ready(dice_loss_ref(logits, true, smooth=1.0))
    # slightly looser tolerance due to approx EUP reciprocal in the softmax
    assert jnp.allclose(loss, ref, atol=1e-4, rtol=1e-4), (loss, ref)

    print("KERNEL_OK")
</pallas_src>

<mosaic_0001>
module attributes {stable_mosaic.version = 11 : i64} {
  func.func @_dice_partials_kernel(%arg0: i32, %arg1: i32, %arg2: memref<1x4x256xf32, #tpu.memory_space<vmem>>, %arg3: memref<1x1x256xi32, #tpu.memory_space<vmem>>, %arg4: memref<1x4x1xf32, #tpu.memory_space<vmem>>, %arg5: memref<1x4x1xf32, #tpu.memory_space<vmem>>, %arg6: memref<4x256xf32, #tpu.memory_space<vmem>>, %arg7: memref<4x256xf32, #tpu.memory_space<vmem>>) attributes {dimension_semantics = [#tpu.dimension_semantics<parallel>, #tpu.dimension_semantics<arbitrary>], iteration_bounds = array<i64: 2, 1>, scalar_prefetch = 0 : i64, scratch_operands = 2 : i64, tpu.core_type = #tpu.core_type<tc>, window_params = [{transform_indices = @transform_0, window_bounds = array<i64: 1, 4, 256>}, {transform_indices = @transform_1, window_bounds = array<i64: 1, 1, 256>}, {transform_indices = @transform_2, window_bounds = array<i64: 1, 4, 1>}, {transform_indices = @transform_3, window_bounds = array<i64: 1, 4, 1>}]} {
    %c0_i32 = arith.constant 0 : i32
    %0 = arith.cmpi eq, %arg1, %c0_i32 : i32
    %1 = arith.extui %0 : i1 to i32
    %c0_i32_0 = arith.constant 0 : i32
    %2 = arith.cmpi ne, %1, %c0_i32_0 : i32
    scf.if %2 {
      %cst_20 = arith.constant 0.000000e+00 : f32
      %46 = vector.broadcast %cst_20 : f32 to vector<4x256xf32>
      %c0_21 = arith.constant 0 : index
      %c0_22 = arith.constant 0 : index
      %47 = vector.load %arg6[%c0_21, %c0_22] : memref<4x256xf32, #tpu.memory_space<vmem>>, vector<4x256xf32>
      tpu.vector_store %arg6[%c0_21, %c0_22], %46 {strides = array<i32>} : memref<4x256xf32, #tpu.memory_space<vmem>>, vector<4x256xf32>,
      %cst_23 = arith.constant 0.000000e+00 : f32
      %48 = vector.broadcast %cst_23 : f32 to vector<4x256xf32>
      %c0_24 = arith.constant 0 : index
      %c0_25 = arith.constant 0 : index
      %49 = vector.load %arg7[%c0_24, %c0_25] : memref<4x256xf32, #tpu.memory_space<vmem>>, vector<4x256xf32>
      tpu.vector_store %arg7[%c0_24, %c0_25], %48 {strides = array<i32>} : memref<4x256xf32, #tpu.memory_space<vmem>>, vector<4x256xf32>,
    } else {
    }
    %c0 = arith.constant 0 : index
    %c0_1 = arith.constant 0 : index
    %c0_2 = arith.constant 0 : index
    %3 = vector.load %arg2[%c0, %c0_1, %c0_2] : memref<1x4x256xf32, #tpu.memory_space<vmem>>, vector<1x4x256xf32>
    %4 = vector.shape_cast %3 : vector<1x4x256xf32> to vector<4x256xf32>
    %cst = arith.constant dense<0xFF800000> : vector<256xf32>
    %5 = vector.multi_reduction <maximumf>, %4, %cst [0] : vector<4x256xf32> to vector<256xf32>
    %6 = vector.shape_cast %5 : vector<256xf32> to vector<1x256xf32>
    %7 = vector.broadcast %6 : vector<1x256xf32> to vector<4x256xf32>
    %8 = arith.subf %4, %7 : vector<4x256xf32>
    %9 = math.exp %8 : vector<4x256xf32>
    %cst_3 = arith.constant dense<0.000000e+00> : vector<256xf32>
    %10 = vector.multi_reduction <add>, %9, %cst_3 [0] : vector<4x256xf32> to vector<256xf32>
    %11 = vector.shape_cast %10 : vector<256xf32> to vector<1x256xf32>
    %12 = tpu.reciprocal %11 {approx = true} : vector<1x256xf32> -> vector<1x256xf32>
    %13 = vector.broadcast %12 : vector<1x256xf32> to vector<4x256xf32>
    %14 = arith.mulf %9, %13 : vector<4x256xf32>
    %c0_4 = arith.constant 0 : index
    %c0_5 = arith.constant 0 : index
    %c0_6 = arith.constant 0 : index
    %15 = vector.load %arg3[%c0_4, %c0_5, %c0_6] : memref<1x1x256xi32, #tpu.memory_space<vmem>>, vector<1x1x256xi32>
    %16 = vector.shape_cast %15 : vector<1x1x256xi32> to vector<1x256xi32>
    %17 = tpu.iota {dimensions = array<i32: 0>} : vector<4x256xi32>
    %18 = vector.broadcast %16 : vector<1x256xi32> to vector<4x256xi32>
    %19 = arith.cmpi eq, %17, %18 : vector<4x256xi32>
    %20 = tpu.iota {dimensions = array<i32: 1>} : vector<1x256xi32>
    %c256_i32 = arith.constant 256 : i32
    %21 = arith.muli %arg1, %c256_i32 : i32
    %22 = vector.broadcast %21 : i32 to vector<1x256xi32>
    %23 = arith.addi %22, %20 : vector<1x256xi32>
    %c256_i32_7 = arith.constant 256 : i32
    %24 = vector.broadcast %c256_i32_7 : i32 to vector<1x256xi32>
    %25 = arith.cmpi slt, %23, %24 : vector<1x256xi32>
    %c0_8 = arith.constant 0 : index
    %c0_9 = arith.constant 0 : index
    %26 = vector.load %arg6[%c0_8, %c0_9] : memref<4x256xf32, #tpu.memory_space<vmem>>, vector<4x256xf32>
    %27 = vector.broadcast %25 : vector<1x256xi1> to vector<4x256xi1>
    %28 = arith.andi %19, %27 : vector<4x256xi1>
    %cst_10 = arith.constant 0.000000e+00 : f32
    %29 = vector.broadcast %cst_10 : f32 to vector<4x256xf32>
    %30 = arith.select %28, %14, %29 : vector<4x256xi1>, vector<4x256xf32>
    %31 = arith.addf %26, %30 : vector<4x256xf32>
    %c0_11 = arith.constant 0 : index
    %c0_12 = arith.constant 0 : index
    %32 = vector.load %arg6[%c0_11, %c0_12] : memref<4x256xf32, #tpu.memory_space<vmem>>, vector<4x256xf32>
    tpu.vector_store %arg6[%c0_11, %c0_12], %31 {strides = array<i32>} : memref<4x256xf32, #tpu.memory_space<vmem>>, vector<4x256xf32>,
    %c0_13 = arith.constant 0 : index
    %c0_14 = arith.constant 0 : index
    %33 = vector.load %arg7[%c0_13, %c0_14] : memref<4x256xf32, #tpu.memory_space<vmem>>, vector<4x256xf32>
    %34 = arith.extui %19 : vector<4x256xi1> to vector<4x256xi32>
    %35 = arith.sitofp %34 : vector<4x256xi32> to vector<4x256xf32>
    %36 = arith.addf %14, %35 : vector<4x256xf32>
    %cst_15 = arith.constant 0.000000e+00 : f32
    %37 = vector.shape_cast %25 : vector<1x256xi1> to vector<1x256xi1>
    %38 = vector.broadcast %37 : vector<1x256xi1> to vector<4x256xi1>
    %39 = vector.broadcast %cst_15 : f32 to vector<4x256xf32>
    %40 = arith.select %38, %36, %39 : vector<4x256xi1>, vector<4x256xf32>
    %41 = arith.addf %33, %40 : vector<4x256xf32>
    %c0_16 = arith.constant 0 : index
    %c0_17 = arith.constant 0 : index
    %42 = vector.load %arg7[%c0_16, %c0_17] : memref<4x256xf32, #tpu.memory_space<vmem>>, vector<4x256xf32>
    tpu.vector_store %arg7[%c0_16, %c0_17], %41 {strides = array<i32>} : memref<4x256xf32, #tpu.memory_space<vmem>>, vector<4x256xf32>,
    %c0_i32_18 = arith.constant 0 : i32
    %43 = arith.cmpi eq, %arg1, %c0_i32_18 : i32
    %44 = arith.extui %43 : i1 to i32
    %c0_i32_19 = arith.constant 0 : i32
    %45 = arith.cmpi ne, %44, %c0_i32_19 : i32
    scf.if %45 {
      %c0_20 = arith.constant 0 : index
      %c0_21 = arith.constant 0 : index
      %46 = vector.load %arg6[%c0_20, %c0_21] : memref<4x256xf32, #tpu.memory_space<vmem>>, vector<4x256xf32>
      %cst_22 = arith.constant dense<0.000000e+00> : vector<4xf32>
      %47 = vector.multi_reduction <add>, %46, %cst_22 [1] : vector<4x256xf32> to vector<4xf32>
      %48 = vector.shape_cast %47 : vector<4xf32> to vector<4x1xf32>
      %c0_23 = arith.constant 0 : index
      %c0_24 = arith.constant 0 : index
      %c0_25 = arith.constant 0 : index
      %49 = vector.load %arg4[%c0_23, %c0_24, %c0_25] : memref<1x4x1xf32, #tpu.memory_space<vmem>>, vector<1x4x1xf32>
      %50 = vector.shape_cast %49 : vector<1x4x1xf32> to vector<4x1xf32>
      %51 = vector.shape_cast %48 : vector<4x1xf32> to vector<1x4x1xf32>
      tpu.vector_store %arg4[%c0_23, %c0_24, %c0_25], %51 {strides = array<i32>} : memref<1x4x1xf32, #tpu.memory_space<vmem>>, vector<1x4x1xf32>,
      %c0_26 = arith.constant 0 : index
      %c0_27 = arith.constant 0 : index
      %52 = vector.load %arg7[%c0_26, %c0_27] : memref<4x256xf32, #tpu.memory_space<vmem>>, vector<4x256xf32>
      %cst_28 = arith.constant dense<0.000000e+00> : vector<4xf32>
      %53 = vector.multi_reduction <add>, %52, %cst_28 [1] : vector<4x256xf32> to vector<4xf32>
      %54 = vector.shape_cast %53 : vector<4xf32> to vector<4x1xf32>
      %c0_29 = arith.constant 0 : index
      %c0_30 = arith.constant 0 : index
      %c0_31 = arith.constant 0 : index
      %55 = vector.load %arg5[%c0_29, %c0_30, %c0_31] : memref<1x4x1xf32, #tpu.memory_space<vmem>>, vector<1x4x1xf32>
      %56 = vector.shape_cast %55 : vector<1x4x1xf32> to vector<4x1xf32>
      %57 = vector.shape_cast %54 : vector<4x1xf32> to vector<1x4x1xf32>
      tpu.vector_store %arg5[%c0_29, %c0_30, %c0_31], %57 {strides = array<i32>} : memref<1x4x1xf32, #tpu.memory_space<vmem>>, vector<1x4x1xf32>,
    } else {
    }
    return
  }
  func.func @transform_0(%arg0: i32, %arg1: i32) -> (i32, i32, i32) {
    %c0_i32 = arith.constant 0 : i32
    %c0_i32_0 = arith.constant 0 : i32
    return %arg0, %c0_i32, %arg1 : i32, i32, i32
  }
  func.func @transform_1(%arg0: i32, %arg1: i32) -> (i32, i32, i32) {
    %c0_i32 = arith.constant 0 : i32
    %c0_i32_0 = arith.constant 0 : i32
    return %arg0, %c0_i32, %arg1 : i32, i32, i32
  }
  func.func @transform_2(%arg0: i32, %arg1: i32) -> (i32, i32, i32) {
    %c0_i32 = arith.constant 0 : i32
    %c0_i32_0 = arith.constant 0 : i32
    %c0_i32_1 = arith.constant 0 : i32
    return %arg0, %c0_i32, %c0_i32_0 : i32, i32, i32
  }
  func.func @transform_3(%arg0: i32, %arg1: i32) -> (i32, i32, i32) {
    %c0_i32 = arith.constant 0 : i32
    %c0_i32_0 = arith.constant 0 : i32
    %c0_i32_1 = arith.constant 0 : i32
    return %arg0, %c0_i32, %c0_i32_0 : i32, i32, i32
  }
}

</mosaic_0001>

<bundles_post_ra>
// kernel: tpu_custom_call.1
= control target key start
LH: loop header
LB: loop body
LE: loop exit
PB: predicated region body
PF: predicated region fallthrough
CT: control target
= control target key end

     0   :  { %9 = vsyncpa [#allocation5], 0  ;;  %s942_s0 = inlined_call_operand.hbm [shape: f32[2,4,256], index: 0, kind: input, shape index: {}]   ;;  %s943_s1 = inlined_call_operand.hbm [shape: s32[2,1,256], index: 1, kind: input, shape index: {}]   ;;  %s944_s2 = inlined_call_operand.vmem [shape: f32[2,4,1], index: 2, kind: output, shape index: {0}]   ;;  %s945_s3 = inlined_call_operand.vmem [shape: f32[2,4,1], index: 3, kind: output, shape index: {1}]  }
   0x1   :  { %11 = vsyncpa [#allocation5 + $0x1], 0 }
   0x2   :  { %12 = vsyncpa [#allocation7], 0 }
   0x3   :  { %14 = vsyncpa [#allocation7 + $0x1], 0  ;;  %s762_s12 = smov 0   ;;  %s764_s13 = smov 0  }
   0x4   :  { %s766_s14 = smov 0   ;;  %s768_s15 = smov 0  }
   0x5   :  { %s770_s16 = smov 0   ;;  %s772_s17 = smov 0  }
   0x6 LB: > { %s532_s18 = sadd.s32 4294967295, %s737_s17   ;;  %s32_s19 = sadd.s32 1, %s733_s16  ;;  %s737_s17 = sphi %s772_s17, %s20_s17   ;;  %s733_s16 = sphi %s770_s16, %s959_s16   ;;  %s729_s15 = sphi %s768_s15, %s958_s15   ;;  %s725_s14 = sphi %s766_s14, %s957_s14   ;;  %s721_s13 = sphi %s764_s13, %s956_s13   ;;  %s717_s12 = sphi %s762_s12, %s955_s12  }
   0x7   : > { %p34_p0 = scmp.ge.s32.totalorder %s32_s19, 2  ;;  %s41_s20 = sadd.s32 1, %s725_s14 }
   0x8   : > { %p48_p1 = scmp.ne.s32.totalorder %s725_s14, %s721_s13  ;;  %p49_p2 = scmp.eq.s32.totalorder %s737_s17, 0 }
   0x9   : > { %s961_s19 = smov (%p34_p0, %s32_s19), 0  ;;  %p54_p4 = scmp.ne.s32.totalorder %s721_s13, %s717_s12 }
   0xa   : > { %p798_p3 = por %p49_p2, %p48_p1  ;;  %s36_s22 = ssub.s32 %s733_s16, %s961_s19 }
   0xb   : > { %p55_p5 = scmp.eq.s32.totalorder %s532_s18, 0  ;;  %p39_p6 = scmp.eq.s32.totalorder %s36_s22, 0 }
   0xc   : > { %p566_p8 = scmp.lt.s32.totalorder %s737_s17, 2  ;;  %s814_s25 = sand.u32 1, %s725_s14  }
   0xd   : > { %p805_p7 = por %p55_p5, %p54_p4  ;;  %s551_s26 = sshll.u32 %s733_s16, 7 }
   0xe   : > { %s811_s24 = scalar_select %p39_p6, %s725_s14, %s41_s20  }
   0xf   : > { %s948_s23 = scalar_select %p805_p7, 1, 0 }
  0x10   : > { %s536_s27 = sshll.u32 %s814_s25, 3  ;;  %s821_s30 = scalar_lea.hbm %s942_s0, %s551_s26 }
  0x11   : > { %s162_s4 = scalar_lea.vmem [#allocation4], %s536_s27  ;;  %p825_p9 = pnand %p566_p8, %p798_p3 }
  0x12   : > { %s172_s5 = sshll.u32 %s162_s4, 4  ;;  %s159_s7 = scalar_lea.sflag [#allocation5], %s814_s25  ;;  %s829_s5 = int_to_ptr.vmem [resolvable:$true] %s172_s5 }
  0x13   : > { %s623_s8 = scalar_lea.hbm %s821_s30, 128  ;;  %p625_p13 = pneg %p825_p9 }
  0x14   : > { %p624_p12 = scmp.ne.s32.totalorder %s821_s30, %s623_s8  ;;  %s628_s11 = scalar_lea.hbm %s942_s0, 256 }
  0x15   : > { %p629_p2 = scmp.lt.u32.totalorder %s821_s30, %s942_s0  ;;  %p630_p3 = scmp.lt.u32.totalorder %s628_s11, %s623_s8 }
  0x16   : > { %p626_p0 = pnand %p625_p13, %p624_p12  ;;  %p632_p5 = scmp.lt.u32.totalorder %s623_s8, %s821_s30 }
  0x17   : > { %p631_p4 = por %p630_p3, %p629_p2 }
  0x18   : > { %p627_p1 = pneg %p626_p0 }
  0x19   : > { %p633_p6 = por %p632_p5, %p631_p4 }
  0x1b   : > { %p634_p8 = pnand %p633_p6, %p627_p1 }
  0x1d   : > { %637 = shalt.err (!%p634_p8)
}
  0x1e   : > { %s638_s20 = scalar_lea.vmem %s829_s5, 128  ;;  %s739_s21 = smov [#allocation4]  }
  0x1f   : > { %p639_p12 = scmp.ne.s32.totalorder %s829_s5, %s638_s20  ;;  %s643_s22 = sshll.u32 %s739_s21, 4  ;;  %s644_s22 = int_to_ptr.vmem [resolvable:$false] %s643_s22 }
  0x20   : > { %s645_s26 = scalar_lea.vmem %s644_s22, 256  ;;  %p646_p11 = scmp.lt.s32.totalorder %s829_s5, %s644_s22 }
  0x21   : > { %p641_p0 = pnand %p639_p12, %p625_p13  ;;  %p647_p2 = scmp.lt.s32.totalorder %s645_s26, %s638_s20 }
  0x23   : > { %p642_p10 = pneg %p641_p0  ;;  %p648_p3 = por %p647_p2, %p646_p11 }
  0x25   : > { %p649_p4 = pnand %p648_p3, %p642_p10 }
  0x27   : > { %652 = shalt.err (!%p649_p4)
}
  0x28   : > { %562 = dma.hbm_to_vmem [thread:$0]  (!%p825_p9), %s821_s30, 128, %s829_s5, %s159_s7  }
  0x29   : > { %p950_p1 = scmp.lt.s32.totalorder %s737_s17, 3  ;;  %p951_p5 = scmp.ge.s32.totalorder %s737_s17, 1 }
  0x2a   : > { %s539_s28 = sshll.u32 %s814_s25, 1  ;;  %s552_s29 = sshll.u32 %s733_s16, 5 }
  0x2b   : > { %p863_p6 = pnand %p951_p5, %p950_p1  ;;  %s872_s9 = scalar_lea.hbm %s943_s1, %s552_s29 }
  0x2c   : > { %s183_s10 = scalar_lea.vmem [#allocation6], %s539_s28  ;;  %s180_s30 = scalar_lea.sflag [#allocation7], %s814_s25 }
  0x2d   : > { %s952_s27 = scalar_select %p863_p6, 1, 0 }
  0x2e   : > { %s193_s11 = sshll.u32 %s183_s10, 4  ;;  %s653_s5 = scalar_lea.hbm %s872_s9, 32  ;;  %s194_s11 = int_to_ptr.vmem [resolvable:$true] %s193_s11 }
  0x2f   : > { %p654_p10 = scmp.ne.s32.totalorder %s872_s9, %s653_s5  ;;  %s658_s18 = scalar_lea.hbm %s943_s1, 64 }
  0x30   : > { %p659_p12 = scmp.lt.u32.totalorder %s872_s9, %s943_s1  ;;  %p660_p0 = scmp.lt.u32.totalorder %s658_s18, %s653_s5 }
  0x31   : > { %p656_p11 = pnand %p654_p10, %p625_p13  ;;  %p662_p3 = scmp.lt.u32.totalorder %s653_s5, %s872_s9 }
  0x32   : > { %p661_p2 = por %p660_p0, %p659_p12 }
  0x33   : > { %p657_p8 = pneg %p656_p11 }
  0x34   : > { %p663_p4 = por %p662_p3, %p661_p2 }
  0x36   : > { %p664_p1 = pnand %p663_p4, %p657_p8 }
  0x38   : > { %667 = shalt.err (!%p664_p1)
}
  0x39   : > { %s668_s25 = scalar_lea.vmem %s194_s11, 32  ;;  %s740_s22 = smov [#allocation6]  }
  0x3a   : > { %p669_p5 = scmp.ne.s32.totalorder %s194_s11, %s668_s25  ;;  %s673_s26 = sshll.u32 %s740_s22, 4  ;;  %s674_s26 = int_to_ptr.vmem [resolvable:$false] %s673_s26 }
  0x3b   : > { %s675_s28 = scalar_lea.vmem %s674_s26, 64  ;;  %p676_p7 = scmp.lt.s32.totalorder %s194_s11, %s674_s26 }
  0x3c   : > { %p671_p10 = pnand %p669_p5, %p625_p13  ;;  %p677_p6 = scmp.lt.s32.totalorder %s675_s28, %s668_s25 }
  0x3e   : > { %p672_p11 = pneg %p671_p10  ;;  %p678_p0 = por %p677_p6, %p676_p7 }
  0x40   : > { %p679_p12 = pnand %p678_p0, %p672_p11 }
  0x42   : > { %682 = shalt.err (!%p679_p12)
}
  0x43   : > { %565 = dma.hbm_to_vmem [thread:$0]  (!%p825_p9), %s872_s9, 32, %s194_s11, %s180_s30  }
  0x44   : > { %p953_p8 = scmp.ne.s32.totalorder %s952_s27, 0 }
  0x45   : > { %s204_s29 = sand.u32 (!%p953_p8), 1, %s721_s13   ;;  %p954_p13 = scmp.ne.s32.totalorder (!%p953_p8), %s948_s23, 0 }
  0x46   : > { %202 = sbr.rel (%p953_p8) target bundleno = 299 (0x12b), region = 28  ;;  %s543_s4 = sshll.u32 (!%p953_p8), %s204_s29, 3 }
  0x47   : > { %s205_s8 = scalar_lea.sflag (!%p953_p8), [#allocation5], %s204_s29  ;;  %s208_s10 = scalar_lea.vmem (!%p953_p8), [#allocation4], %s543_s4 }
  0x4d   : > { %708 = dma.done.wait (%p954_p13), %s205_s8, 128  }
  0x4e   : > { %710 = vsyncadd (%p954_p13), %s205_s8, 4294967168  ;;  %s544_s5 = sshll.u32 %s204_s29, 1  ;;  %s214_s7 = scalar_lea.sflag [#allocation7], %s204_s29 }
  0x4f   : > { %s901_s6 = scalar_lea.vmem [#allocation6], %s544_s5 }
  0x50   : > { %712 = dma.done.wait (%p954_p13), %s214_s7, 32  }
  0x51   : > { %714 = vsyncadd (%p954_p13), %s214_s7, 4294967264  ;;  %vm268_vm0 = vcmask 1043456   ;;  %v264_v0 = vld [vmem:[%s208_s10] sm:$0xff]  ;;  %v315_v26 = vlaneseq  ;;  %v314_v39 = vld [vmem:[%s901_s6] sm:$0x3]  ;;  %v741_v43 = vmov 0.0  }
  0x52   : > { %v266_v1 = vcombine.high %v264_v0, %v264_v0  ;;  %v269_v2 = vsel %vm268_vm0, %v264_v0, -inf  ;;  %p250_p7 = scmp.lt.s32.totalorder %s729_s15, 1  ;;  %vm387_vm3 = vcmask 3072  }
  0x53   : > { %v270_v3 = vrot.slane %v269_v2, 4  ;;  %v316_v31 = vshrl.u32 %v315_v26, 7 }
  0x54   : > { %v276_v4 = vsel %vm268_vm0, %v266_v1, -inf  ;;  %s963_s15 = smov (!%p250_p7, %s729_s15), 1 }
  0x55   : > { %v271_v5 = vmax.f32 %v269_v2, %v270_v3  ;;  %v277_v6 = vrot.slane %v276_v4, 4  ;;  %v319_v36 = vsub.s32 0, %v316_v31  ;;  %v323_v37 = vsub.s32 1, %v316_v31  ;;  %s545_s23 = sshll.u32 %s963_s15, 2 }
  0x56   : > { %s253_s11 = scalar_lea.vmem %s944_s2, %s545_s23  ;;  %s257_s18 = scalar_lea.vmem %s945_s3, %s545_s23 }
  0x57   : > { %v272_v7 = vrot.slane %v271_v5, 2  ;;  %v278_v8 = vmax.f32 %v276_v4, %v277_v6  ;;  %v320_v40 = vrot.slane %v314_v39, %v319_v36  ;;  %v324_v41 = vrot.slane %v314_v39, %v323_v37 }
  0x59   : > { %v273_v9 = vmax.f32 %v271_v5, %v272_v7  ;;  %v279_v10 = vrot.slane %v278_v8, 2  ;;  %vm325_vm1 = vcmp.eq.s32.totalorder %v316_v31, %v320_v40  ;;  %vm326_vm2 = vcmp.eq.s32.totalorder %v316_v31, %v324_v41 }
  0x5a   : > { %v547_v44 = vsel %vm325_vm1, 1.0, %v741_v43  ;;  %v548_v45 = vsel %vm326_vm2, 1.0, %v741_v43 }
  0x5b   : > { %v274_v11 = vrot.slane %v273_v9, 1  ;;  %v280_v12 = vmax.f32 %v278_v8, %v279_v10  ;;  %v361_v48 = vcombine.low %v547_v44, %v548_v45 }
  0x5d   : > { %v275_v13 = vmax.f32 %v273_v9, %v274_v11  ;;  %v281_v14 = vrot.slane %v280_v12, 1 }
  0x5f   : > { %v282_v15 = vmax.f32 %v280_v12, %v281_v14 }
  0x61   : > { %v285_v16 = vcombine.low %v275_v13, %v282_v15 }
  0x63   : > { %v287_v17 = vsub.f32 %v264_v0, %v285_v16 }
  0x65   : > { %v288_v18 = vmul.f32 1.442695, %v287_v17 }
  0x67   : > { %617 = vpow2.f32 %v288_v18 }
  0x71   : > { %v618_v19 = vpop.eup %617 }
  0x72   : > { %v291_v20 = vcombine.high %v618_v19, %v618_v19  ;;  %v293_v21 = vsel %vm268_vm0, %v618_v19, 0.0 }
  0x73   : > { %v294_v22 = vrot.slane %v293_v21, 4 }
  0x74   : > { %v300_v23 = vsel %vm268_vm0, %v291_v20, 0.0 }
  0x75   : > { %v295_v24 = vadd.f32 %v294_v22, %v293_v21  ;;  %v301_v25 = vrot.slane %v300_v23, 4 }
  0x77   : > { %v296_v27 = vrot.slane %v295_v24, 2  ;;  %v302_v28 = vadd.f32 %v301_v25, %v300_v23 }
  0x79   : > { %v297_v29 = vadd.f32 %v296_v27, %v295_v24  ;;  %v303_v30 = vrot.slane %v302_v28, 2 }
  0x7b   : > { %v298_v32 = vrot.slane %v297_v29, 1  ;;  %v304_v33 = vadd.f32 %v303_v30, %v302_v28 }
  0x7d   : > { %v299_v34 = vadd.f32 %v298_v32, %v297_v29  ;;  %v305_v35 = vrot.slane %v304_v33, 1 }
  0x7f   : > { %v306_v38 = vadd.f32 %v305_v35, %v304_v33  ;;  %619 = vrcp.f32 %v299_v34 }
  0x81   : > { %621 = vrcp.f32 %v306_v38 }
  0x89   : > { %v620_v42 = vpop.eup %619 }
  0x8b   : > { %v622_v46 = vpop.eup %621 }
  0x8c   : > { %v311_v47 = vcombine.low %v620_v42, %v622_v46 }
  0x8e   : > { %v313_v49 = vmul.f32 %v618_v19, %v311_v47 }
  0x90   : > { %v344_v50 = vcombine.high %v313_v49, %v313_v49  ;;  %v346_v51 = vsel %vm325_vm1, %v313_v49, 0.0  ;;  %v363_v52 = vadd.f32 %v361_v48, %v313_v49 }
  0x92   : > { %v347_v53 = vsel %vm326_vm2, %v344_v50, 0.0  ;;  %v365_v54 = vcombine.high %v363_v52, %v363_v52 }
  0x93   : > { %v350_v55 = vcombine.low %v346_v51, %v347_v53  ;;  %v553_v56 = vcombine.low %v347_v53, %v347_v53 }
  0x94   : > { %v371_v57 = vcombine.low %v363_v52, %v365_v54  ;;  %v394_v60 = vsel %vm268_vm0, %v365_v54, 0.0 }
  0x95   : > { %v382_v58 = vsel %vm268_vm0, %v350_v55, 0.0  ;;  %v383_v59 = vsel %vm268_vm0, %v553_v56, 0.0 }
  0x96   : > { %v384_v61 = vadd.f32 %v383_v59, %v382_v58  ;;  %v393_v62 = vsel %vm268_vm0, %v371_v57, 0.0 }
  0x97   : > { %v395_v63 = vadd.f32 %v394_v60, %v393_v62 }
  0x98   : > { %385 = vadd.xlane.f32.xlu0 %v384_v61 }
  0x9c   : > { %396 = vadd.xlane.f32.xlu0 %v395_v63 }
 0x125   : > { %v386_v0 = vpop.xlane.xlu0 %385 }
 0x126   : > { %388 = vst.msk [vmem:[%s253_s11] sm:$0xf] %vm387_vm3, %v386_v0 }
 0x129   : > { %v397_v1 = vpop.xlane.xlu0 %396 }
 0x12a   : > { %398 = vst.msk [vmem:[%s257_s18] sm:$0xf] %vm387_vm3, %v397_v1 }
 0x12b PF: > { %s20_s17 = sadd.s32 1, %s737_s17   ;;  %s955_s12 = smov %s721_s13 }
 0x12c   : > { %p17_p9 = scmp.ge.s32.totalorder %s20_s17, 4   ;;  %s956_s13 = smov %s725_s14 }
 0x12d   : > { %s957_s14 = smov %s811_s24  ;;  %s958_s15 = smov %s733_s16 }
 0x12e   : > { %s959_s16 = smov %s961_s19  ;;  %19 = sbr.rel (!%p17_p9) target bundleno = 6 (0x6), region = 101 }
 0x135   :  { %432 = vsyncpa [#allocation5], 1 }
 0x136   :  { %434 = vsyncpa [#allocation5 + $0x1], 1 }
 0x137   :  { %435 = vsyncpa [#allocation7], 1 }
 0x138   :  { %437 = vsyncpa [#allocation7 + $0x1], 1 }

</bundles_post_ra>
